<compile_context>
chip_gen: v7x
topology: tpu7x:2x2x1
jax: 0.10.0
libtpu: 0.0.40
codegen_flags: <defaults>
</compile_context>

<pallas_src>
import jax
import jax.numpy as jnp
from jax.experimental import pallas as pl
from jax.experimental.pallas import tpu as pltpu

BN_EPS = 1e-5
_MAX_BATCH_BLOCK = 4096  # lanes (batch rows) per grid step; 256 KiB of x per
                         # block in the transposed layout -> fits every chip.


def _action_discriminator_kernel(
    xt_ref,   # (F, Bt)  input, feature-major (batch on the lane axis)
    w1t_ref,  # (H, F)   Linear1 weight (BatchNorm folded in), transposed
    p_ref,    # (H, 4)   packed params: [b1_eff | w2 | b2@row0 | (1,1/c)@rows0:2]
    out_ref,  # (2, Bt)  row 0 = s, row 1 = s / c  (lane-dense store)
):
    # BatchNorm1d(eval) + Linear(F -> H): BN pre-folded into w1/b1 host-side.
    ht = jnp.dot(w1t_ref[...], xt_ref[...],
                 preferred_element_type=jnp.float32)        # (H, Bt)
    ht = ht + p_ref[:, 0:1]                                  # + b1_eff (lane bcast)
    ht = jnp.maximum(ht, 0.0)                                # ReLU

    # Dropout: identity in eval mode.
    # TODO(synk): training-mode dropout (pltpu.prng_* mask) not emitted here.

    # Linear(H -> 1): VPU multiply by w2 column + sublane reduce over H.
    logits = jnp.sum(ht * p_ref[:, 1:2], axis=0, keepdims=True)  # (1, Bt)
    logits = logits + p_ref[0:1, 2:3]                            # + b2

    # Exact sigmoid (exp on the EUP; the divide is not a bottleneck here and
    # keeps s strictly inside [0, 1]).
    s = 1.0 / (1.0 + jnp.exp(-logits))                           # (1, Bt)

    # One lane-dense store of both outputs: rows scaled by [1, 1/c].
    out_ref[...] = (s * p_ref[0:2, 3:4]).astype(out_ref.dtype)   # (2, Bt)


def fold_batchnorm_params(params, eps=BN_EPS):
    """Fold eval-mode BatchNorm1d into the first Linear (host-side, one-off)."""
    scale = params["bn_gamma"] * jax.lax.rsqrt(params["bn_var"] + eps)   # (1, F)
    shift = params["bn_beta"] - params["bn_mean"] * scale                # (1, F)
    w1 = params["w1"]                                                    # (F, H)
    w1_eff = w1 * scale.reshape(-1, 1)                                   # (F, H)
    b1_eff = (params["b1"] + shift @ w1).reshape(-1)                     # (H,)
    return {
        "w1t": jnp.asarray(w1_eff.T),          # (H, F) feature-major weight
        "b1_eff": b1_eff,                      # (H,)
        "w2": params["w2"].reshape(-1),        # (H,)
        "b2": params["b2"].reshape(()),        # scalar
    }


def pack_params(folded, c):
    """Pack b1_eff, w2, b2 and the [1, 1/c] output scales into one (H, 4) slab."""
    H = folded["b1_eff"].shape[0]
    assert H >= 2, "hidden_dim must be >= 2 for the packed-parameter layout"
    col_b2 = jnp.zeros((H,), jnp.float32).at[0].set(folded["b2"])
    col_sc = (jnp.zeros((H,), jnp.float32)
              .at[0].set(1.0)
              .at[1].set(1.0 / float(c)))
    return jnp.stack(
        [folded["b1_eff"].astype(jnp.float32),
         folded["w2"].astype(jnp.float32),
         col_b2, col_sc],
        axis=1,
    )  # (H, 4)


def _pick_block_b(B):
    """Batch-lane block size: full array when small, else a multiple of 128
    chosen so the grid has >= 2 blocks (lets "parallel" shard across the two
    v7x TensorCores)."""
    if B <= 128:
        return B
    half = pl.cdiv(B, 2)
    half_rounded = ((half + 127) // 128) * 128
    return min(_MAX_BATCH_BLOCK, half_rounded)


def action_discriminator_forward(x, folded, c=1.0):
    """Forward pass with pre-folded params. Returns (s, s / c), each (B, 1)."""
    if c == 0:
        raise ValueError("ActionDiscriminator: c must be nonzero.")
    B, F = x.shape
    H = folded["w1t"].shape[0]

    xt = jnp.transpose(x).astype(jnp.float32)     # (F, B): batch on the lane axis
    packed = pack_params(folded, c)               # (H, 4)

    block_b = _pick_block_b(B)
    grid = (pl.cdiv(B, block_b),)

    cost = pl.CostEstimate(
        flops=2 * B * F * H + 4 * B * H + 6 * B,
        transcendentals=B,  # one exp per row
        bytes_accessed=4 * (B * F + H * F + 4 * H + 2 * B),
    )

    out = pl.pallas_call(
        _action_discriminator_kernel,
        out_shape=jax.ShapeDtypeStruct((2, B), jnp.float32),
        grid=grid,
        in_specs=[
            pl.BlockSpec((F, block_b), lambda i: (0, i)),  # x^T: tiled over batch lanes
            pl.BlockSpec((H, F), lambda i: (0, 0)),        # w1t: resident (2 KiB)
            pl.BlockSpec((H, 4), lambda i: (0, 0)),        # packed params (0.5 KiB)
        ],
        out_specs=pl.BlockSpec((2, block_b), lambda i: (0, i)),
        compiler_params=pltpu.CompilerParams(
            # Batch blocks are independent -> shardable across v7x's 2 TensorCores.
            dimension_semantics=("parallel",),
        ),
        cost_estimate=cost,
    )(xt, folded["w1t"], packed)

    # Split the lane-merged (2, B) output back into the module's (s, s/c) pair.
    s = jnp.transpose(out[0:1, :])        # (B, 1)
    s_div_c = jnp.transpose(out[1:2, :])  # (B, 1)
    return s, s_div_c


def init_params(key, input_dim, hidden_dim):
    """Deterministic synthetic parameters matching the module's shapes."""
    k1, k2, k3, k4, k5, k6 = jax.random.split(key, 6)
    return {
        # BatchNorm1d(input_dim): weight, bias, running_mean, running_var
        "bn_gamma": jax.random.uniform(k1, (1, input_dim), jnp.float32, 0.5, 1.5),
        "bn_beta": jax.random.normal(k2, (1, input_dim), jnp.float32) * 0.1,
        "bn_mean": jax.random.normal(k3, (1, input_dim), jnp.float32) * 0.1,
        "bn_var": jax.random.uniform(k4, (1, input_dim), jnp.float32, 0.5, 1.5),
        # Linear(input_dim, hidden_dim) — stored (in, out)
        "w1": jax.random.normal(k5, (input_dim, hidden_dim), jnp.float32)
        / jnp.sqrt(input_dim).astype(jnp.float32),
        "b1": jnp.zeros((1, hidden_dim), jnp.float32),
        # Linear(hidden_dim, 1) — stored (in, out)
        "w2": jax.random.normal(k6, (hidden_dim, 1), jnp.float32)
        / jnp.sqrt(hidden_dim).astype(jnp.float32),
        "b2": jnp.zeros((1, 1), jnp.float32),
    }


def reference_forward(x, params, c=1.0):
    """Pure-JAX (exact, unfolded) reference for correctness checking."""
    xn = (x - params["bn_mean"]) / jnp.sqrt(params["bn_var"] + BN_EPS)
    xn = xn * params["bn_gamma"] + params["bn_beta"]
    h = jnp.maximum(xn @ params["w1"] + params["b1"], 0.0)
    s = jax.nn.sigmoid(h @ params["w2"] + params["b2"])
    return s, s / c


if __name__ == "__main__":
    # args.cate_num = 8 -> input_dim = 16 ; args.ad_hidden_dim = 32 ; batch = 8
    cate_num = 8
    input_dim = 2 * cate_num
    hidden_dim = 32
    batch = 8
    c = 2.0  # exercise the set_c path

    key = jax.random.PRNGKey(0)
    kx, kx2, kp = jax.random.split(key, 3)
    x = jax.random.normal(kx, (batch, input_dim), jnp.float32)
    params = init_params(kp, input_dim, hidden_dim)
    folded = fold_batchnorm_params(params)

    # --- Small batch: single block, grid=(1,) ---
    s, s_div_c = action_discriminator_forward(x, folded, c=c)
    jax.block_until_ready((s, s_div_c))
    s_ref, s_div_c_ref = reference_forward(x, params, c=c)
    assert s.shape == (batch, 1) and s_div_c.shape == (batch, 1)
    # Tolerance covers possible bf16-pass handling of the f32 MXU matmul;
    # observed error is ~1e-5.
    assert jnp.allclose(s, s_ref, atol=2e-3, rtol=1e-3)
    assert jnp.allclose(s_div_c, s_div_c_ref, atol=2e-3, rtol=1e-3)

    # --- Non-divisible batch: 2 blocks of 256 lanes, last block partial (44
    #     valid lanes) -> exercises the masked out-of-bounds lane writes. ---
    batch2 = 300
    x2 = jax.random.normal(kx2, (batch2, input_dim), jnp.float32)
    s2, s2_div_c = action_discriminator_forward(x2, folded, c=c)
    jax.block_until_ready((s2, s2_div_c))
    s2_ref, s2_div_c_ref = reference_forward(x2, params, c=c)
    assert s2.shape == (batch2, 1) and s2_div_c.shape == (batch2, 1)
    assert jnp.allclose(s2, s2_ref, atol=2e-3, rtol=1e-3)
    assert jnp.allclose(s2_div_c, s2_div_c_ref, atol=2e-3, rtol=1e-3)

    print("KERNEL_OK")
</pallas_src>

<mosaic_0001>
module attributes {stable_mosaic.version = 11 : i64} {
  func.func @_action_discriminator_kernel(%arg0: i32, %arg1: memref<16x8xf32, #tpu.memory_space<vmem>>, %arg2: memref<32x16xf32, #tpu.memory_space<vmem>>, %arg3: memref<32x4xf32, #tpu.memory_space<vmem>>, %arg4: memref<2x8xf32, #tpu.memory_space<vmem>>) attributes {dimension_semantics = [#tpu.dimension_semantics<parallel>], iteration_bounds = array<i64: 1>, scalar_prefetch = 0 : i64, scratch_operands = 0 : i64, tpu.core_type = #tpu.core_type<tc>, window_params = [{transform_indices = @transform_0, window_bounds = array<i64: 16, 8>}, {pipeline_mode = #tpu.pipeline_mode<synchronous>, transform_indices = @transform_1, window_bounds = array<i64: 32, 16>}, {pipeline_mode = #tpu.pipeline_mode<synchronous>, transform_indices = @transform_2, window_bounds = array<i64: 32, 4>}, {transform_indices = @transform_3, window_bounds = array<i64: 2, 8>}]} {
    %c0 = arith.constant 0 : index
    %c0_0 = arith.constant 0 : index
    %0 = vector.load %arg2[%c0, %c0_0] : memref<32x16xf32, #tpu.memory_space<vmem>>, vector<32x16xf32>
    %c0_1 = arith.constant 0 : index
    %c0_2 = arith.constant 0 : index
    %1 = vector.load %arg1[%c0_1, %c0_2] : memref<16x8xf32, #tpu.memory_space<vmem>>, vector<16x8xf32>
    %cst = arith.constant dense<0.000000e+00> : vector<32x8xf32>
    %2 = tpu.matmul %0, %1, %cst {dimension_numbers = #tpu.dot_dimension_numbers<[1], [0], [0], [1], [0, 0, 1, 1], [], []>} : vector<32x16xf32>, vector<16x8xf32>, vector<32x8xf32> -> vector<32x8xf32>
    %c0_3 = arith.constant 0 : index
    %c0_4 = arith.constant 0 : index
    %3 = vector.load %arg3[%c0_3, %c0_4] : memref<32x4xf32, #tpu.memory_space<vmem>>, vector<32x1xf32>
    %4 = vector.broadcast %3 : vector<32x1xf32> to vector<32x8xf32>
    %5 = arith.addf %2, %4 : vector<32x8xf32>
    %cst_5 = arith.constant 0.000000e+00 : f32
    %6 = vector.broadcast %cst_5 : f32 to vector<32x8xf32>
    %7 = arith.maximumf %5, %6 : vector<32x8xf32>
    %c0_6 = arith.constant 0 : index
    %c1 = arith.constant 1 : index
    %8 = vector.load %arg3[%c0_6, %c1] : memref<32x4xf32, #tpu.memory_space<vmem>>, vector<32x1xf32>
    %9 = vector.broadcast %8 : vector<32x1xf32> to vector<32x8xf32>
    %10 = arith.mulf %7, %9 : vector<32x8xf32>
    %cst_7 = arith.constant dense<0.000000e+00> : vector<8xf32>
    %11 = vector.multi_reduction <add>, %10, %cst_7 [0] : vector<32x8xf32> to vector<8xf32>
    %12 = vector.shape_cast %11 : vector<8xf32> to vector<1x8xf32>
    %c0_8 = arith.constant 0 : index
    %c2 = arith.constant 2 : index
    %13 = vector.load %arg3[%c0_8, %c2] : memref<32x4xf32, #tpu.memory_space<vmem>>, vector<1x1xf32>
    %14 = vector.broadcast %13 : vector<1x1xf32> to vector<1x8xf32>
    %15 = arith.addf %12, %14 : vector<1x8xf32>
    %cst_9 = arith.constant 0.000000e+00 : f32
    %16 = vector.broadcast %cst_9 : f32 to vector<1x8xf32>
    %17 = arith.subf %16, %15 : vector<1x8xf32>
    %18 = math.exp %17 : vector<1x8xf32>
    %cst_10 = arith.constant 1.000000e+00 : f32
    %19 = vector.broadcast %cst_10 : f32 to vector<1x8xf32>
    %20 = arith.addf %19, %18 : vector<1x8xf32>
    %cst_11 = arith.constant 1.000000e+00 : f32
    %21 = vector.broadcast %cst_11 : f32 to vector<1x8xf32>
    %22 = arith.divf %21, %20 : vector<1x8xf32>
    %c0_12 = arith.constant 0 : index
    %c3 = arith.constant 3 : index
    %23 = vector.load %arg3[%c0_12, %c3] : memref<32x4xf32, #tpu.memory_space<vmem>>, vector<2x1xf32>
    %24 = vector.broadcast %22 : vector<1x8xf32> to vector<2x8xf32>
    %25 = vector.broadcast %23 : vector<2x1xf32> to vector<2x8xf32>
    %26 = arith.mulf %24, %25 : vector<2x8xf32>
    %c0_13 = arith.constant 0 : index
    %c0_14 = arith.constant 0 : index
    %27 = vector.load %arg4[%c0_13, %c0_14] : memref<2x8xf32, #tpu.memory_space<vmem>>, vector<2x8xf32>
    tpu.vector_store %arg4[%c0_13, %c0_14], %26 {strides = array<i32>} : memref<2x8xf32, #tpu.memory_space<vmem>>, vector<2x8xf32>,
    return
  }
  func.func @transform_0(%arg0: i32) -> (i32, i32) {
    %c0_i32 = arith.constant 0 : i32
    %c0_i32_0 = arith.constant 0 : i32
    return %c0_i32, %arg0 : i32, i32
  }
  func.func @transform_1(%arg0: i32) -> (i32, i32) {
    %c0_i32 = arith.constant 0 : i32
    %c0_i32_0 = arith.constant 0 : i32
    %c0_i32_1 = arith.constant 0 : i32
    return %c0_i32, %c0_i32_0 : i32, i32
  }
  func.func @transform_2(%arg0: i32) -> (i32, i32) {
    %c0_i32 = arith.constant 0 : i32
    %c0_i32_0 = arith.constant 0 : i32
    %c0_i32_1 = arith.constant 0 : i32
    return %c0_i32, %c0_i32_0 : i32, i32
  }
  func.func @transform_3(%arg0: i32) -> (i32, i32) {
    %c0_i32 = arith.constant 0 : i32
    %c0_i32_0 = arith.constant 0 : i32
    return %c0_i32, %arg0 : i32, i32
  }
}

</mosaic_0001>

<bundles_post_ra>
// kernel: tpu_custom_call.1
= control target key start
LH: loop header
LB: loop body
LE: loop exit
PB: predicated region body
PF: predicated region fallthrough
CT: control target
= control target key end

     0   :  { %vm45_vm0 = vcmask 130048   ;;  %v286_v5 = vmov 0   ;;  %s363_s0 = inlined_call_operand.vmem [shape: f32[16,8], index: 0, kind: input, shape index: {}]   ;;  %s364_s1 = inlined_call_operand.vmem [shape: f32[32,16], index: 1, kind: input, shape index: {}]   ;;  %s365_s2 = inlined_call_operand.vmem [shape: f32[32,4], index: 2, kind: input, shape index: {}]   ;;  %s366_s3 = inlined_call_operand.hbm [shape: f32[2,8], index: 3, kind: output, shape index: {}]  }
   0x1   :  { %v19_v0 = vld [vmem:[%s363_s0] sm:$0xff]  ;;  %v20_v1 = vld [vmem:[%s363_s0 + $0x8] sm:$0xff]  ;;  %v17_v4 = vld [vmem:[%s364_s1 + $0x10] sm:$0xff]  ;;  %253 = vset.pattern.permute.xlu1 %v286_v5  ;;  %252 = vset.pattern.permute.xlu0 %v286_v5 }
   0x2   :  { %v15_v2 = vld [vmem:[%s364_s1] sm:$0xff]  ;;  %v241_v3 = vpack.c.bf16 %v20_v1, %v19_v0  ;;  %238 = vmatprep.mubr.msk.f32.mxu1 %vm45_vm0, %v17_v4  ;;  %v23_v6 = vld [vmem:[%s365_s2 + $0x10] sm:$0xff]  ;;  %v16_v8 = vld [vmem:[%s364_s1 + $0x8] sm:$0xff] }
   0x3   :  { %235 = vmatprep.mubr.msk.f32.mxu0 %vm45_vm0, %v15_v2  ;;  %v21_v7 = vld [vmem:[%s365_s2] sm:$0xff]  ;;  %v18_v9 = vld [vmem:[%s364_s1 + $0x18] sm:$0xff] }
   0x4   :  { %242 = vmatprep.subr.bf16.mxu0 %v241_v3  ;;  %245 = vmatprep.subr.bf16.mxu1 %v241_v3 }
   0x5   :  { %244 = vmatpush3.bf16.msra.mxu0 %v241_v3  ;;  %246 = vmatpush3.bf16.msra.mxu1 %v241_v3 }
   0x6   :  { %8 = vsyncpa [#allocation3], 0  ;;  %37 = vperm.xlu1 %253, %v23_v6   ;;  %27 = vperm.xlu0 %252, %v21_v7   ;;  %v24_v10 = vld [vmem:[%s365_s2 + $0x18] sm:$0xff]  ;;  %v22_v11 = vld [vmem:[%s365_s2 + $0x8] sm:$0xff]  ;;  %v287_v12 = vmov 1   ;;  %v288_v15 = vmov 2   ;;  %v195_v60 = vlaneseq }
   0x7   :  { %v181_v13 = vld [vmem:[%s365_s2] sm:$0x1]  ;;  %v289_v16 = vmov 3   ;;  %vm167_vm1 = vcmask 64512   ;;  %vm205_vm2 = vcmask 58368  }
   0x8   :  { %236 = vmatmul.mubr.msk.f32.vlgmr.msra.gmra.mrb[0].mxu0 %vm45_vm0, %v16_v8  ;;  %239 = vmatmul.mubr.msk.f32.vlgmr.msra.gmra.mrb[0].mxu1 %vm45_vm0, %v18_v9  ;;  %v194_v14 = vld [vmem:[%s365_s2] sm:$0x3]  ;;  %v196_v61 = vshrl.u32 %v195_v60, 7  ;;  %s290_s2 = smov [#allocation2]  }
   0x9   :  { %s213_s7 = sshll.u32 %s290_s2, 4  ;;  %s214_s7 = int_to_ptr.vmem [resolvable:$true] %s213_s7 }
   0xa   :  { %42 = vperm.xlu1 %253, %v24_v10   ;;  %32 = vperm.xlu0 %252, %v22_v11   ;;  %v197_v62 = vsub.s32 0, %v196_v61  ;;  %s262_s8 = scalar_lea.vmem %s214_s7, 32  ;;  %p267_p1 = scmp.lt.s32.totalorder %s214_s7, %s214_s7 }
   0xb   :  { %p263_p0 = scmp.ne.s32.totalorder %s214_s7, %s262_s8  ;;  %p268_p2 = scmp.lt.s32.totalorder %s262_s8, %s262_s8 }
   0xd   :  { %p269_p3 = por %p268_p2, %p267_p1 }
   0xe   :  { %255 = vset.pattern.permute.xlu1 %v287_v12  ;;  %254 = vset.pattern.permute.xlu0 %v287_v12 }
   0xf   :  { %152 = vperm.xlu1 %255, %v22_v11   ;;  %148 = vperm.xlu0 %254, %v21_v7   ;;  %p270_p4 = pnand %p269_p3, %p263_p0 }
  0x13   :  { %156 = vperm.xlu1 %255, %v23_v6   ;;  %160 = vperm.xlu0 %254, %v24_v10  }
  0x17   :  { %256 = vset.pattern.permute.xlu1 %v288_v15  ;;  %257 = vset.pattern.permute.xlu0 %v289_v16 }
  0x18   :  { %184 = vperm.xlu1 %256, %v181_v13   ;;  %201 = vperm.xlu0 %257, %v194_v14  }
  0x85   :  { %v38_v17 = vpop.permute.xlu1 %37  ;;  %v28_v18 = vpop.permute.xlu0 %27 }
  0x89   :  { %v43_v19 = vpop.permute.xlu1 %42  ;;  %v33_v20 = vpop.permute.xlu0 %32 }
  0x8e   :  { %v153_v21 = vpop.permute.xlu1 %152  ;;  %v149_v22 = vpop.permute.xlu0 %148 }
  0x92   :  { %v157_v36 = vpop.permute.xlu1 %156  ;;  %v161_v37 = vpop.permute.xlu0 %160 }
  0x97   :  { %v185_v53 = vpop.permute.xlu1 %184  ;;  %v202_v0 = vpop.permute.xlu0 %201 }
  0xdb   :  { %v237_v23 = vpop.f32.mrb[0].mxu0  ;;  %v240_v24 = vpop.f32.mrb[0].mxu1 }
  0xdc   :  { %v130_v25 = vadd.f32 %v237_v23, %v33_v20  ;;  %v140_v26 = vadd.f32 %v240_v24, %v43_v19  ;;  %v124_v27 = vpop.f32.mrb[1].mxu0  ;;  %v134_v28 = vpop.f32.mrb[1].mxu1 }
  0xdd   :  { %v125_v29 = vadd.f32 %v124_v27, %v28_v18  ;;  %v135_v30 = vadd.f32 %v134_v28, %v38_v17 }
  0xde   :  { %v144_v31 = vmax.f32 %v130_v25, 0.0  ;;  %v146_v32 = vmax.f32 %v140_v26, 0.0 }
  0xdf   :  { %v143_v33 = vmax.f32 %v125_v29, 0.0  ;;  %v145_v34 = vmax.f32 %v135_v30, 0.0 }
  0xe0   :  { %v164_v35 = vmul.f32 %v153_v21, %v144_v31  ;;  %v166_v42 = vmul.f32 %v161_v37, %v146_v32 }
  0xe1   :  { %v163_v38 = vmul.f32 %v149_v22, %v143_v33  ;;  %v165_v39 = vmul.f32 %v157_v36, %v145_v34 }
  0xe2   :  { %v169_v40 = vsel %vm167_vm1, %v164_v35, 0.0  ;;  %v173_v46 = vsel %vm167_vm1, %v166_v42, 0.0 }
  0xe3   :  { %v168_v41 = vsel %vm167_vm1, %v163_v38, 0.0  ;;  %v171_v44 = vsel %vm167_vm1, %v165_v39, 0.0 }
  0xe4   :  { %v170_v43 = vadd.f32 %v169_v40, %v168_v41 }
  0xe6   :  { %v172_v45 = vadd.f32 %v171_v44, %v170_v43 }
  0xe8   :  { %v174_v47 = vadd.f32 %v173_v46, %v172_v45 }
  0xea   :  { %v175_v48 = vrot.slane %v174_v47, 4 }
  0xec   :  { %v176_v49 = vadd.f32 %v175_v48, %v174_v47 }
  0xee   :  { %v177_v50 = vrot.slane %v176_v49, 2 }
  0xf0   :  { %v178_v51 = vadd.f32 %v177_v50, %v176_v49 }
  0xf2   :  { %v179_v52 = vrot.slane %v178_v51, 1 }
  0xf4   :  { %v180_v54 = vadd.f32 %v179_v52, %v178_v51 }
  0xf6   :  { %v187_v55 = vadd.f32 %v185_v53, %v180_v54 }
  0xf8   :  { %v188_v56 = vsub.f32 0.0, %v187_v55 }
  0xfa   :  { %v189_v57 = vmul.f32 1.442695, %v188_v56 }
  0xfc   :  { %258 = vpow2.f32 %v189_v57 }
 0x106   :  { %v259_v58 = vpop.eup %258 }
 0x107   :  { %v191_v59 = vadd.f32 1.0, %v259_v58 }
 0x109   :  { %260 = vrcp.f32 %v191_v59 }
 0x113   :  { %v261_v63 = vpop.eup %260 }
 0x114   :  { %v198_v1 = vrot.slane %v261_v63, %v197_v62 }
 0x116   :  { %v204_v2 = vmul.f32 %v202_v0, %v198_v1 }
 0x118   :  { %206 = vst.msk [vmem:[#allocation2] sm:$0x3] %vm205_vm2, %v204_v2 }
 0x119   :  { %273 = shalt.err (!%p270_p4)
}
 0x11a   :  { %s274_s11 = scalar_lea.hbm %s366_s3, 32 }
 0x11b   :  { %p275_p5 = scmp.ne.s32.totalorder %s366_s3, %s274_s11  ;;  %p278_p6 = scmp.lt.u32.totalorder %s274_s11, %s366_s3 }
 0x11d   :  { %p280_p7 = pnand %p278_p6, %p275_p5 }
 0x11f   :  { %283 = shalt.err (!%p280_p7)
}
 0x120   :  { %216 = dma.vmem_to_hbm [thread:$0]  %s214_s7, 32, %s366_s3, [#allocation3]  }
 0x121   :  { %284 = dma.done.wait [#allocation3], 32  }
 0x122   :  { %285 = vsyncadd [#allocation3], 4294967264 }
 0x123   :  { %220 = vsyncpa [#allocation3], 1 }

</bundles_post_ra>
